<compile_context>
chip_gen: v7x
topology: tpu7x:2x2x1
jax: 0.10.0
libtpu: 0.0.40
codegen_flags: <defaults>
</compile_context>

<pallas_src>
import math

import jax
import jax.numpy as jnp
from jax.experimental import pallas as pl
from jax.experimental.pallas import tpu as pltpu


def _round_up(a, m):
    return (a + m - 1) // m * m


def _layer_dims(din, dout, W, depth, skip_at):
    """(fan_in, fan_out) per layer, replicating Normal_Network.__init__."""
    dims = [(din, W)]
    for i in range(depth - 1):
        dims.append((W + din if i in skip_at else W, W))
    dims.append((W, dout))
    return dims


def _make_kernel(layer_plan, dout):
    """layer_plan[i] = dict(main=(w_off, out_p, in_y),
    skip=None | (w_off, out_p, in_x), b_off=int) — all static Python ints."""
    n_layers = len(layer_plan)

    def kernel(x_ref, w_ref, b_ref, out_ref):
        x = x_ref[...]                       # bf16 [din, tm]  (batch on lanes)
        y = x
        for li, lp in enumerate(layer_plan):
            w_off, out_p, in_y = lp["main"]
            w = w_ref[w_off:w_off + out_p, :in_y]            # bf16 [out_p, in_y]
            z = jnp.dot(w, y, preferred_element_type=jnp.float32)
            if lp["skip"] is not None:
                wx_off, _, in_x = lp["skip"]
                wx = w_ref[wx_off:wx_off + out_p, :in_x]     # bf16 [out_p, din]
                z = z + jnp.dot(wx, x, preferred_element_type=jnp.float32)
            b_off = lp["b_off"]
            z = z + b_ref[b_off:b_off + out_p, :]            # f32 bias, lane-bcast
            if li != n_layers - 1:
                y = jnp.maximum(z, 0.0).astype(x.dtype)      # ReLU, back to bf16
            else:
                # Drop sublane padding rows; lane-dense [dout, tm] store.
                out_ref[...] = z[:dout, :].astype(out_ref.dtype)

    return kernel


def _pick_tm(N, tm_max=512):
    """Lane-axis batch tile: multiple of 128 dividing N, as large as possible
    while still giving >= 4 grid steps (>= 2 per v7x TensorCore)."""
    if N % 128 != 0:
        return N                              # lane dim == full array dim
    cands = [t for t in range(128, min(tm_max, N) + 1, 128) if N % t == 0]
    best = cands[0]
    for t in cands:
        if N // t >= 4:
            best = t
    return best


def normal_network_pallas(x, weights, biases, skip_at, *, tm_max=512):
    """x: [N, din].  weights[i]: [out_i, in_i] (native nn.Linear layout).
    biases[i]: [out_i].  Returns [N, dout] float32."""
    N, din = x.shape
    n_layers = len(weights)
    dout = int(weights[-1].shape[0])
    # skip must feed a hidden layer (matches the PyTorch module construction)
    assert all(0 <= s <= n_layers - 3 for s in skip_at), skip_at
    skip_consumers = {s + 1 for s in skip_at}

    comp_dtype = jnp.bfloat16

    # ---- pack params: one bf16 weight slab + one f32 bias column slab ----
    w_parts, b_parts, layer_plan = [], [], []
    w_rows = b_rows = 0
    flops = 0
    for li in range(n_layers):
        w = jnp.asarray(weights[li], jnp.float32)
        b = jnp.asarray(biases[li], jnp.float32).reshape(-1)
        out_i, in_i = int(w.shape[0]), int(w.shape[1])
        out_p = _round_up(out_i, 8)
        pad_r = out_p - out_i
        b_parts.append(jnp.pad(b, (0, pad_r)).reshape(out_p, 1))
        if li in skip_consumers:
            in_y = int(weights[li - 1].shape[0])     # prev layer output width
            in_x = in_i - in_y
            assert in_x == din, (in_i, in_y, din)
            main = (w_rows, out_p, in_y)
            w_parts.append(jnp.pad(w[:, :in_y], ((0, pad_r), (0, 0))))
            w_rows += out_p
            skip = (w_rows, out_p, in_x)
            w_parts.append(jnp.pad(w[:, in_y:], ((0, pad_r), (0, 0))))
            w_rows += out_p
        else:
            main = (w_rows, out_p, in_i)
            w_parts.append(jnp.pad(w, ((0, pad_r), (0, 0))))
            w_rows += out_p
            skip = None
        layer_plan.append(dict(main=main, skip=skip, b_off=b_rows))
        b_rows += out_p
        flops += 2 * N * in_i * out_i                # true (unpadded) widths

    in_max = max(int(p.shape[1]) for p in w_parts)
    w_parts = [jnp.pad(p, ((0, 0), (0, in_max - int(p.shape[1])))) for p in w_parts]
    w_slab = jnp.concatenate(w_parts, axis=0).astype(comp_dtype)  # [w_rows, in_max] bf16
    b_slab = jnp.concatenate(b_parts, axis=0)                     # [b_rows, 1] f32

    # ---- input in transposed (feature-on-sublane, batch-on-lane) layout ----
    x_t = jnp.asarray(x, comp_dtype).T                            # [din, N] bf16

    tm = _pick_tm(N, tm_max)
    assert N % tm == 0, (N, tm)
    grid = (N // tm,)

    bytes_accessed = (x_t.size * x_t.dtype.itemsize
                      + w_slab.size * w_slab.dtype.itemsize
                      + b_slab.size * b_slab.dtype.itemsize
                      + N * dout * 4)

    kernel = _make_kernel(layer_plan, dout)

    out_t = pl.pallas_call(
        kernel,
        out_shape=jax.ShapeDtypeStruct((dout, N), jnp.float32),
        grid_spec=pltpu.PrefetchScalarGridSpec(
            num_scalar_prefetch=0,
            grid=grid,
            in_specs=[
                pl.BlockSpec((din, tm), lambda i: (0, i)),
                # Constant-index slabs: DMA'd once, resident across the grid.
                # TODO(synk): add pipeline_mode=pl.Buffered(1) to these two
                # specs if W is scaled up enough for 2x slab buffering to
                # matter against v7x's 64 MiB VMEM.
                pl.BlockSpec(w_slab.shape, lambda i: (0, 0)),
                pl.BlockSpec(b_slab.shape, lambda i: (0, 0)),
            ],
            out_specs=pl.BlockSpec((dout, tm), lambda i: (0, i)),
        ),
        compiler_params=pltpu.CompilerParams(
            dimension_semantics=("parallel",)),
        cost_estimate=pl.CostEstimate(
            flops=flops, transcendentals=0, bytes_accessed=bytes_accessed),
    )(x_t, w_slab, b_slab)

    # [dout, N] -> [N, dout] to match the PyTorch module's output layout
    # (dout*N*4 ~ 12 KB here; negligible vs the old 512 KB padded slice).
    return out_t.T


def normal_network_ref(x, weights, biases, skip_at):
    """Pure-JAX reference mirroring the PyTorch forward (explicit concat)."""
    y = x
    n = len(weights)
    for li in range(n):
        y = y @ weights[li].T + biases[li]
        if li != n - 1:
            y = jnp.maximum(y, 0.0)
        if li in skip_at:
            y = jnp.concatenate([y, x], axis=-1)
    return y


def init_params(key, dims):
    """PyTorch-Linear-style uniform init; weights in native [out, in] layout."""
    weights, biases = [], []
    for (fan_in, fan_out) in dims:
        key, kw, kb = jax.random.split(key, 3)
        bound = 1.0 / math.sqrt(fan_in)
        weights.append(jax.random.uniform(kw, (fan_out, fan_in), jnp.float32,
                                          minval=-bound, maxval=bound))
        biases.append(jax.random.uniform(kb, (fan_out,), jnp.float32,
                                         minval=-bound, maxval=bound))
    return weights, biases


if __name__ == "__main__":
    # Config consistent with the module: Normal_Network(din=8, dout=3, W=32,
    # depth=4, skip_at=[2]).
    din, dout, W, depth = 8, 3, 32, 4
    skip_at = [2]
    N = 1024          # -> tm=256, grid=(4,): >= 2 steps per v7x TensorCore

    dims = _layer_dims(din, dout, W, depth, skip_at)

    key = jax.random.PRNGKey(0)
    key, kx = jax.random.split(key)
    x = jax.random.normal(kx, (N, din), jnp.float32)
    weights, biases = init_params(key, dims)

    out = normal_network_pallas(x, weights, biases, skip_at)
    out = jax.block_until_ready(out)
    assert out.shape == (N, dout), out.shape

    # Reference #1: same forward with the bf16-quantized params/input the
    # kernel consumes (kernel additionally keeps bf16 activations between
    # layers, hence the tolerance).
    wq = [w.astype(jnp.bfloat16).astype(jnp.float32) for w in weights]
    xq = x.astype(jnp.bfloat16).astype(jnp.float32)
    ref_q = normal_network_ref(xq, wq, biases, skip_at)
    err_q = float(jnp.max(jnp.abs(out - ref_q)))
    assert err_q < 5e-2, err_q

    # Reference #2: pure f32 reference (original module semantics), looser tol
    # because weights/activations are bf16 inside the kernel.
    ref_f32 = normal_network_ref(x, weights, biases, skip_at)
    err_f = float(jnp.max(jnp.abs(out - ref_f32)))
    assert err_f < 1e-1, err_f

    print("KERNEL_OK")
</pallas_src>

<mosaic_0001>
module attributes {stable_mosaic.version = 11 : i64} {
  func.func @kernel(%arg0: i32, %arg1: memref<8x256xbf16, #tpu.memory_space<vmem>>, %arg2: memref<168x32xbf16, #tpu.memory_space<vmem>>, %arg3: memref<136x1xf32, #tpu.memory_space<vmem>>, %arg4: memref<3x256xf32, #tpu.memory_space<vmem>>) attributes {dimension_semantics = [#tpu.dimension_semantics<parallel>], iteration_bounds = array<i64: 4>, scalar_prefetch = 0 : i64, scratch_operands = 0 : i64, tpu.core_type = #tpu.core_type<tc>, window_params = [{transform_indices = @transform_0, window_bounds = array<i64: 8, 256>}, {pipeline_mode = #tpu.pipeline_mode<synchronous>, transform_indices = @transform_1, window_bounds = array<i64: 168, 32>}, {pipeline_mode = #tpu.pipeline_mode<synchronous>, transform_indices = @transform_2, window_bounds = array<i64: 136, 1>}, {transform_indices = @transform_3, window_bounds = array<i64: 3, 256>}]} {
    %c0 = arith.constant 0 : index
    %c0_0 = arith.constant 0 : index
    %0 = vector.load %arg1[%c0, %c0_0] : memref<8x256xbf16, #tpu.memory_space<vmem>>, vector<8x256xbf16>
    %c0_1 = arith.constant 0 : index
    %c0_2 = arith.constant 0 : index
    %1 = vector.load %arg2[%c0_1, %c0_2] : memref<168x32xbf16, #tpu.memory_space<vmem>>, vector<32x8xbf16>
    %cst = arith.constant dense<0.000000e+00> : vector<32x256xf32>
    %2 = tpu.matmul %1, %0, %cst {dimension_numbers = #tpu.dot_dimension_numbers<[1], [0], [0], [1], [0, 0, 1, 1], [], []>} : vector<32x8xbf16>, vector<8x256xbf16>, vector<32x256xf32> -> vector<32x256xf32>
    %c0_3 = arith.constant 0 : index
    %c0_4 = arith.constant 0 : index
    %3 = vector.load %arg3[%c0_3, %c0_4] : memref<136x1xf32, #tpu.memory_space<vmem>>, vector<32x1xf32>
    %4 = vector.broadcast %3 : vector<32x1xf32> to vector<32x256xf32>
    %5 = arith.addf %2, %4 : vector<32x256xf32>
    %cst_5 = arith.constant 0.000000e+00 : f32
    %6 = vector.broadcast %cst_5 : f32 to vector<32x256xf32>
    %7 = arith.maximumf %5, %6 : vector<32x256xf32>
    %8 = arith.truncf %7 : vector<32x256xf32> to vector<32x256xbf16>
    %c32 = arith.constant 32 : index
    %c0_6 = arith.constant 0 : index
    %9 = vector.load %arg2[%c32, %c0_6] : memref<168x32xbf16, #tpu.memory_space<vmem>>, vector<32x32xbf16>
    %cst_7 = arith.constant dense<0.000000e+00> : vector<32x256xf32>
    %10 = tpu.matmul %9, %8, %cst_7 {dimension_numbers = #tpu.dot_dimension_numbers<[1], [0], [0], [1], [0, 0, 1, 1], [], []>} : vector<32x32xbf16>, vector<32x256xbf16>, vector<32x256xf32> -> vector<32x256xf32>
    %c32_8 = arith.constant 32 : index
    %c0_9 = arith.constant 0 : index
    %11 = vector.load %arg3[%c32_8, %c0_9] : memref<136x1xf32, #tpu.memory_space<vmem>>, vector<32x1xf32>
    %12 = vector.broadcast %11 : vector<32x1xf32> to vector<32x256xf32>
    %13 = arith.addf %10, %12 : vector<32x256xf32>
    %cst_10 = arith.constant 0.000000e+00 : f32
    %14 = vector.broadcast %cst_10 : f32 to vector<32x256xf32>
    %15 = arith.maximumf %13, %14 : vector<32x256xf32>
    %16 = arith.truncf %15 : vector<32x256xf32> to vector<32x256xbf16>
    %c64 = arith.constant 64 : index
    %c0_11 = arith.constant 0 : index
    %17 = vector.load %arg2[%c64, %c0_11] : memref<168x32xbf16, #tpu.memory_space<vmem>>, vector<32x32xbf16>
    %cst_12 = arith.constant dense<0.000000e+00> : vector<32x256xf32>
    %18 = tpu.matmul %17, %16, %cst_12 {dimension_numbers = #tpu.dot_dimension_numbers<[1], [0], [0], [1], [0, 0, 1, 1], [], []>} : vector<32x32xbf16>, vector<32x256xbf16>, vector<32x256xf32> -> vector<32x256xf32>
    %c64_13 = arith.constant 64 : index
    %c0_14 = arith.constant 0 : index
    %19 = vector.load %arg3[%c64_13, %c0_14] : memref<136x1xf32, #tpu.memory_space<vmem>>, vector<32x1xf32>
    %20 = vector.broadcast %19 : vector<32x1xf32> to vector<32x256xf32>
    %21 = arith.addf %18, %20 : vector<32x256xf32>
    %cst_15 = arith.constant 0.000000e+00 : f32
    %22 = vector.broadcast %cst_15 : f32 to vector<32x256xf32>
    %23 = arith.maximumf %21, %22 : vector<32x256xf32>
    %24 = arith.truncf %23 : vector<32x256xf32> to vector<32x256xbf16>
    %c96 = arith.constant 96 : index
    %c0_16 = arith.constant 0 : index
    %25 = vector.load %arg2[%c96, %c0_16] : memref<168x32xbf16, #tpu.memory_space<vmem>>, vector<32x32xbf16>
    %cst_17 = arith.constant dense<0.000000e+00> : vector<32x256xf32>
    %26 = tpu.matmul %25, %24, %cst_17 {dimension_numbers = #tpu.dot_dimension_numbers<[1], [0], [0], [1], [0, 0, 1, 1], [], []>} : vector<32x32xbf16>, vector<32x256xbf16>, vector<32x256xf32> -> vector<32x256xf32>
    %c128 = arith.constant 128 : index
    %c0_18 = arith.constant 0 : index
    %27 = vector.load %arg2[%c128, %c0_18] : memref<168x32xbf16, #tpu.memory_space<vmem>>, vector<32x8xbf16>
    %cst_19 = arith.constant dense<0.000000e+00> : vector<32x256xf32>
    %28 = tpu.matmul %27, %0, %cst_19 {dimension_numbers = #tpu.dot_dimension_numbers<[1], [0], [0], [1], [0, 0, 1, 1], [], []>} : vector<32x8xbf16>, vector<8x256xbf16>, vector<32x256xf32> -> vector<32x256xf32>
    %29 = arith.addf %26, %28 : vector<32x256xf32>
    %c96_20 = arith.constant 96 : index
    %c0_21 = arith.constant 0 : index
    %30 = vector.load %arg3[%c96_20, %c0_21] : memref<136x1xf32, #tpu.memory_space<vmem>>, vector<32x1xf32>
    %31 = vector.broadcast %30 : vector<32x1xf32> to vector<32x256xf32>
    %32 = arith.addf %29, %31 : vector<32x256xf32>
    %cst_22 = arith.constant 0.000000e+00 : f32
    %33 = vector.broadcast %cst_22 : f32 to vector<32x256xf32>
    %34 = arith.maximumf %32, %33 : vector<32x256xf32>
    %35 = arith.truncf %34 : vector<32x256xf32> to vector<32x256xbf16>
    %c160 = arith.constant 160 : index
    %c0_23 = arith.constant 0 : index
    %36 = vector.load %arg2[%c160, %c0_23] : memref<168x32xbf16, #tpu.memory_space<vmem>>, vector<8x32xbf16>
    %cst_24 = arith.constant dense<0.000000e+00> : vector<8x256xf32>
    %37 = tpu.matmul %36, %35, %cst_24 {dimension_numbers = #tpu.dot_dimension_numbers<[1], [0], [0], [1], [0, 0, 1, 1], [], []>} : vector<8x32xbf16>, vector<32x256xbf16>, vector<8x256xf32> -> vector<8x256xf32>
    %c128_25 = arith.constant 128 : index
    %c0_26 = arith.constant 0 : index
    %38 = vector.load %arg3[%c128_25, %c0_26] : memref<136x1xf32, #tpu.memory_space<vmem>>, vector<8x1xf32>
    %39 = vector.broadcast %38 : vector<8x1xf32> to vector<8x256xf32>
    %40 = arith.addf %37, %39 : vector<8x256xf32>
    %41 = vector.extract_strided_slice %40 {offsets = [0, 0], sizes = [3, 256], strides = [1, 1]} : vector<8x256xf32> to vector<3x256xf32>
    %c0_27 = arith.constant 0 : index
    %c0_28 = arith.constant 0 : index
    %42 = vector.load %arg4[%c0_27, %c0_28] : memref<3x256xf32, #tpu.memory_space<vmem>>, vector<3x256xf32>
    tpu.vector_store %arg4[%c0_27, %c0_28], %41 {strides = array<i32>} : memref<3x256xf32, #tpu.memory_space<vmem>>, vector<3x256xf32>,
    return
  }
  func.func @transform_0(%arg0: i32) -> (i32, i32) {
    %c0_i32 = arith.constant 0 : i32
    %c0_i32_0 = arith.constant 0 : i32
    return %c0_i32, %arg0 : i32, i32
  }
  func.func @transform_1(%arg0: i32) -> (i32, i32) {
    %c0_i32 = arith.constant 0 : i32
    %c0_i32_0 = arith.constant 0 : i32
    %c0_i32_1 = arith.constant 0 : i32
    return %c0_i32, %c0_i32_0 : i32, i32
  }
  func.func @transform_2(%arg0: i32) -> (i32, i32) {
    %c0_i32 = arith.constant 0 : i32
    %c0_i32_0 = arith.constant 0 : i32
    %c0_i32_1 = arith.constant 0 : i32
    return %c0_i32, %c0_i32_0 : i32, i32
  }
  func.func @transform_3(%arg0: i32) -> (i32, i32) {
    %c0_i32 = arith.constant 0 : i32
    %c0_i32_0 = arith.constant 0 : i32
    return %c0_i32, %arg0 : i32, i32
  }
}

</mosaic_0001>

<bundles_post_ra>
// kernel: tpu_custom_call.1
= control target key start
LH: loop header
LB: loop body
LE: loop exit
PB: predicated region body
PF: predicated region fallthrough
CT: control target
= control target key end

     0   :  { %8 = vsyncpa [#allocation3], 0  ;;  %s1243_s0 = inlined_call_operand.vmem [shape: bf16[8,1024], index: 0, kind: input, shape index: {}]   ;;  %s1244_s1 = inlined_call_operand.vmem [shape: bf16[168,32], index: 1, kind: input, shape index: {}]   ;;  %s1245_s2 = inlined_call_operand.vmem [shape: f32[136,1], index: 2, kind: input, shape index: {}]   ;;  %s1246_s3 = inlined_call_operand.hbm [shape: f32[3,1024], index: 3, kind: output, shape index: {}]  }
   0x1   :  { %10 = vsyncpa [#allocation3 + $0x1], 0  ;;  %s1025_s12 = smov 0   ;;  %s1027_s13 = smov 0  }
   0x2   :  { %s1029_s14 = smov 0   ;;  %s1031_s15 = smov 0  }
   0x3 LB: > { %s1046_s16 = sadd.s32 4294967295, %s1001_s15   ;;  %s835_s17 = sadd.s32 4294967294, %s1001_s15   ;;  %s1001_s15 = sphi %s1031_s15, %s1252_s15   ;;  %s997_s14 = sphi %s1029_s14, %s1251_s14   ;;  %s993_s13 = sphi %s1027_s13, %s1250_s13   ;;  %s989_s12 = sphi %s1025_s12, %s1249_s12  }
   0x4   : > { %s1050_s18 = sadd.s32 1, %s1001_s15   ;;  %s91_s19 = sadd.s32 1, %s997_s14 }
   0x5   : > { %s88_s20 = ssub.s32 %s1001_s15, %s1050_s18  ;;  %p101_p0 = scmp.ne.s32.totalorder %s997_s14, %s993_s13 }
   0x6   : > { %p89_p1 = scmp.eq.s32.totalorder %s88_s20, 0  ;;  %p102_p2 = scmp.eq.s32.totalorder %s1046_s16, 3 }
   0x7   : > { %p107_p3 = scmp.ne.s32.totalorder %s993_s13, %s989_s12  ;;  %p108_p4 = scmp.eq.s32.totalorder %s835_s17, 3 }
   0x8   : > { %s1061_s21 = scalar_select %p89_p1, %s997_s14, %s91_s19  }
   0x9   : > { %p1063_p5 = por %p102_p2, %p101_p0  ;;  %p1067_p6 = por %p108_p4, %p107_p3 }
   0xa   : > { %p838_p7 = scmp.ge.s32.totalorder %s1001_s15, 1  ;;  %p141_p8 = scmp.lt.s32.totalorder %s1001_s15, 5 }
   0xc   : > { %p142_p9 = pnand %p838_p7, %p141_p8 }
   0xd   : > { %s840_s24 = sshll.u32 (!%p142_p9), %s1046_s16, 1  ;;  %v1003_v0 = vmov (!%p142_p9), 0   ;;  %v178_v1 = vld [vmem:[%s1245_s2] sm:$0xff] (!%p142_p9)  ;;  %v180_v2 = vld [vmem:[%s1245_s2 + $0x10] sm:$0xff] (!%p142_p9)  ;;  %v179_v3 = vld [vmem:[%s1245_s2 + $0x8] sm:$0xff] (!%p142_p9)  ;;  %vm224_vm0 = vcmask (!%p142_p9), 1043456  }
   0xe   : > { %145 = sbr.rel (%p142_p9) target bundleno = 1190 (0x4a6), region = 32  ;;  %p166_p10 = scmp.lt.s32.totalorder (!%p142_p9), %s840_s24, 7  ;;  %263 = vmatprep.mubr.bf16.mxu0 (!%p142_p9), %v1003_v0  ;;  %925 = vset.pattern.permute.xlu0 (!%p142_p9), %v1003_v0  ;;  %v181_v4 = vld [vmem:[%s1245_s2 + $0x18] sm:$0xff] (!%p142_p9)  ;;  %v929_v8 = vld [vmem:[%s1244_s1] sm:$0xff] (!%p142_p9)   ;;  %vm217_vm1 = vcmask (!%p142_p9), 64512   ;;  %v301_v10 = vld [vmem:[%s1245_s2 + $0x28] sm:$0xff] (!%p142_p9) }
   0xf   : > { %926 = vset.pattern.permute.xlu1 (!%p142_p9), %v1003_v0  ;;  %383 = vmatprep.mubr.bf16.mxu1 (!%p142_p9), %v1003_v0  ;;  %v300_v9 = vld [vmem:[%s1245_s2 + $0x20] sm:$0xff] (!%p142_p9)  ;;  %v302_v12 = vld [vmem:[%s1245_s2 + $0x30] sm:$0xff] (!%p142_p9)  ;;  %v303_v13 = vld [vmem:[%s1245_s2 + $0x38] sm:$0xff] (!%p142_p9)  ;;  %vm334_vm2 = vcmask (!%p142_p9), 261120   ;;  %s872_s6 = sshll.u32 (!%p142_p9), %s1046_s16, 7  ;;  %s1004_s16 = smov (!%p142_p9), [#allocation2]  }
  0x10   : > { %184 = vperm.xlu0 (!%p142_p9), %925, %v178_v1   ;;  %194 = vperm.xlu1 (!%p142_p9), %926, %v180_v2   ;;  %v410_v14 = vld [vmem:[%s1245_s2 + $0x40] sm:$0xff] (!%p142_p9)  ;;  %v411_v15 = vld [vmem:[%s1245_s2 + $0x48] sm:$0xff] (!%p142_p9)  ;;  %v412_v17 = vld [vmem:[%s1245_s2 + $0x50] sm:$0xff] (!%p142_p9)  ;;  %s1201_s11 = scalar_lea.hbm (!%p142_p9), %s1246_s3, %s872_s6  ;;  %s943_s20 = sshll.u32 (!%p142_p9), %s1004_s16, 4  ;;  %s944_s20 = int_to_ptr.vmem [resolvable:$false] %s943_s20 }
  0x11   : > { %v930_v16 = vld [vmem:[%s1244_s1 + $0x8] sm:$0xff] (!%p142_p9)   ;;  %v413_v18 = vld [vmem:[%s1245_s2 + $0x58] sm:$0xff] (!%p142_p9)  ;;  %v661_v19 = vld [vmem:[%s1245_s2 + $0x60] sm:$0xff] (!%p142_p9) }
  0x12   : > { %v662_v20 = vld [vmem:[%s1245_s2 + $0x68] sm:$0xff] (!%p142_p9)  ;;  %v663_v21 = vld [vmem:[%s1245_s2 + $0x70] sm:$0xff] (!%p142_p9)  ;;  %v664_v22 = vld [vmem:[%s1245_s2 + $0x78] sm:$0xff] (!%p142_p9) }
  0x13   : > { %v706_v23 = vld [vmem:[%s1245_s2 + $0x80] sm:$0xff] (!%p142_p9)  ;;  %v931_v56 = vld [vmem:[%s1244_s1 + $0x10] sm:$0xff] (!%p142_p9)   ;;  %v932_v57 = vld [vmem:[%s1244_s1 + $0x18] sm:$0xff] (!%p142_p9)  }
  0x14   : > { %189 = vperm.xlu0 (!%p142_p9), %925, %v179_v3   ;;  %199 = vperm.xlu1 (!%p142_p9), %926, %v181_v4  }
  0x15   : > { %s1254_s24 = smov (!%p166_p10, %s840_s24), 7 }
  0x16   : > { %s841_s4 = sshll.u32 %s1254_s24, 2  ;;  %s945_s24 = scalar_lea.vmem %s944_s20, 256 }
  0x17   : > { %s169_s9 = scalar_lea.vmem %s1243_s0, %s841_s4  ;;  %s162_s4 = sand.u32 1, %s993_s13  }
  0x18   : > { %v173_v5 = vld [vmem:[%s169_s9] sm:$0xff]  ;;  %306 = vperm.xlu0 %925, %v300_v9   ;;  %311 = vperm.xlu1 %926, %v301_v10   ;;  %s839_s5 = sshll.u32 %s162_s4, 3  ;;  %s762_s17 = scalar_lea.sflag [#allocation3], %s162_s4 }
  0x19   : > { %v1093_v6 = vcombine.high %v173_v5, %v173_v5  ;;  %v844_v7 = vcombine.low %v173_v5, %v173_v5  ;;  %s164_s7 = scalar_lea.vmem [#allocation2], %s839_s5 }
  0x1a   : > { %s776_s8 = sshll.u32 %s164_s7, 4  ;;  %s1203_s8 = int_to_ptr.vmem [resolvable:$true] %s776_s8 }
  0x1b   : > { %846 = vmatprep.subr.msk.bf16.mxu0 %vm224_vm0, %v1093_v6  ;;  %v1107_v11 = vsel %vm224_vm0, %v844_v7, 0  ;;  %s939_s19 = scalar_lea.vmem %s1203_s8, 128  ;;  %p946_p0 = scmp.lt.s32.totalorder %s1203_s8, %s944_s20 }
  0x1c   : > { %232 = vmatpush1.bf16.msra.mxu0 %v1107_v11  ;;  %316 = vperm.xlu0 %925, %v302_v12   ;;  %p940_p11 = scmp.ne.s32.totalorder %s1203_s8, %s939_s19  ;;  %p947_p1 = scmp.lt.s32.totalorder %s945_s24, %s939_s19 }
  0x1d   : > { %321 = vperm.xlu1 %926, %v303_v13  }
  0x1e   : > { %p941_p12 = pnand %p940_p11, %p1063_p5  ;;  %p948_p2 = por %p947_p1, %p946_p0 }
  0x1f   : > { %847 = vmatmul.mubr.msk.bf16.vlgmr.msra.gmra.mrb[0].mxu0 %vm217_vm1, %v929_v8 }
  0x20   : > { %273 = vmatprep.mubr.bf16.mxu0 %v1003_v0  ;;  %416 = vperm.xlu0 %925, %v410_v14   ;;  %p942_p13 = pneg %p941_p12 }
  0x21   : > { %421 = vperm.xlu1 %926, %v411_v15  }
  0x22   : > { %p949_p3 = pnand %p948_p2, %p942_p13 }
  0x24   : > { %426 = vperm.xlu0 %925, %v412_v17  }
  0x25   : > { %431 = vperm.xlu1 %926, %v413_v18  }
  0x27   : > { %848 = vmatmul.mubr.msk.bf16.gmra.mrb[4].mxu0 %vm217_vm1, %v930_v16 }
  0x28   : > { %373 = vmatprep.mubr.bf16.mxu0 %v1003_v0  ;;  %667 = vperm.xlu0 %925, %v661_v19  }
  0x29   : > { %672 = vperm.xlu1 %926, %v662_v20  }
  0x2c   : > { %677 = vperm.xlu0 %925, %v663_v21  }
  0x2d   : > { %682 = vperm.xlu1 %926, %v664_v22  }
  0x30   : > { %709 = vperm.xlu0 %925, %v706_v23  }
  0x8f   : > { %v185_v24 = vpop.permute.xlu0 %184  ;;  %v195_v33 = vpop.permute.xlu1 %194 }
  0x93   : > { %v190_v28 = vpop.permute.xlu0 %189  ;;  %v200_v44 = vpop.permute.xlu1 %199 }
  0x97   : > { %v307_v58 = vpop.permute.xlu0 %306  ;;  %v312_v59 = vpop.permute.xlu1 %311 }
  0x9b   : > { %v317_v60 = vpop.permute.xlu0 %316 }
  0x9c   : > { %v322_v61 = vpop.permute.xlu1 %321 }
  0xf2   : > { %v265_v25 = vpop.f32.mrb[0].mxu0 }
  0xf3   : > { %v266_v26 = vadd.f32 %v265_v25, %v185_v24  ;;  %v267_v27 = vpop.f32.mrb[1].mxu0 }
  0xf4   : > { %v268_v29 = vadd.f32 %v267_v27, %v185_v24  ;;  %v269_v30 = vpop.f32.mrb[2].mxu0  ;;  %v933_v27 = vld [vmem:[%s1244_s1 + $0x20] sm:$0xff]  }
  0xf5   : > { %v270_v31 = vadd.f32 %v269_v30, %v190_v28  ;;  %v271_v32 = vpop.f32.mrb[3].mxu0  ;;  %v284_v35 = vmax.f32 %v266_v26, 0.0  ;;  %v936_v30 = vld [vmem:[%s1244_s1 + $0x48] sm:$0xff]  }
  0xf6   : > { %v272_v34 = vadd.f32 %v271_v32, %v190_v28  ;;  %v285_v37 = vmax.f32 %v268_v29, 0.0  ;;  %v934_v28 = vld [vmem:[%s1244_s1 + $0x28] sm:$0xff]   ;;  %v935_v29 = vld [vmem:[%s1244_s1 + $0x40] sm:$0xff]  }
  0xf7   : > { %v286_v36 = vmax.f32 %v270_v31, 0.0  ;;  %v417_v31 = vpop.permute.xlu0 %416 }
  0xf8   : > { %v287_v38 = vmax.f32 %v272_v34, 0.0 }
  0xf9   : > { %v292_v39 = vpack.c.bf16 %v286_v36, %v284_v35  ;;  %v422_v35 = vpop.permute.xlu1 %421 }
  0xfa   : > { %v293_v40 = vpack.c.bf16 %v287_v38, %v285_v37  ;;  %v275_v41 = vpop.f32.mrb[4].mxu0 }
  0xfb   : > { %v276_v42 = vadd.f32 %v275_v41, %v195_v33  ;;  %v277_v43 = vpop.f32.mrb[5].mxu0 }
  0xfc   : > { %v278_v45 = vadd.f32 %v277_v43, %v195_v33  ;;  %v279_v46 = vpop.f32.mrb[6].mxu0  ;;  %341 = vmatprep.subr.bf16.mxu0 %v293_v40  ;;  %873 = vmatprep.subr.bf16.mxu1 %v293_v40 }
  0xfd   : > { %v280_v47 = vadd.f32 %v279_v46, %v200_v44  ;;  %v281_v48 = vpop.f32.mrb[7].mxu0  ;;  %342 = vmatpush1.bf16.msra.mxu0 %v292_v39  ;;  %875 = vmatpush1.bf16.msra.mxu1 %v292_v39  ;;  %v288_v50 = vmax.f32 %v276_v42, 0.0  ;;  %v427_v46 = vpop.permute.xlu0 %426 }
  0xfe   : > { %v282_v49 = vadd.f32 %v281_v48, %v200_v44  ;;  %v289_v52 = vmax.f32 %v278_v45, 0.0 }
  0xff   : > { %v290_v51 = vmax.f32 %v280_v47, 0.0 }
 0x100   : > { %v291_v53 = vmax.f32 %v282_v49, 0.0 }
 0x101   : > { %v294_v54 = vpack.c.bf16 %v290_v51, %v288_v50  ;;  %v432_v51 = vpop.permute.xlu1 %431 }
 0x102   : > { %v295_v55 = vpack.c.bf16 %v291_v53, %v289_v52 }
 0x104   : > { %343 = vmatprep.subr.bf16.mxu0 %v295_v55  ;;  %874 = vmatprep.subr.bf16.mxu1 %v295_v55 }
 0x105   : > { %344 = vmatpush1.bf16.msra.mxu0 %v294_v54  ;;  %876 = vmatpush1.bf16.msra.mxu1 %v294_v54 }
 0x106   : > { %859 = vmatprep.subr.msk.bf16.mxu1 %vm224_vm0, %v1093_v6 }
 0x108   : > { %851 = vmatmul.mubr.msk.bf16.vlgmr.msra.gmra.mrb[8].mxu0 %vm334_vm2, %v931_v56  ;;  %852 = vmatmul.mubr.msk.bf16.vlgmr.msra.gmra.mrb[0].mxu1 %vm334_vm2, %v932_v57 }
 0x109   : > { %482 = vmatprep.mubr.bf16.mxu0 %v1003_v0  ;;  %540 = vmatpush1.bf16.msra.mxu1 %v1107_v11 }
 0x10a   : > { %571 = vmatprep.mubr.bf16.mxu1 %v1003_v0 }
 0x110   : > { %860 = vmatmul.mubr.msk.bf16.vlgmr.msra.gmra.mrb[4].mxu1 %vm217_vm1, %v935_v29 }
 0x111   : > { %581 = vmatprep.mubr.bf16.mxu1 %v1003_v0 }
 0x118   : > { %861 = vmatmul.mubr.msk.bf16.gmra.mrb[8].mxu1 %vm217_vm1, %v936_v30 }
 0x119   : > { %640 = vmatprep.mubr.bf16.mxu1 %v1003_v0 }
 0x1db   : > { %v375_v62 = vpop.f32.mrb[8].mxu0  ;;  %v385_v63 = vpop.f32.mrb[0].mxu1 }
 0x1dc   : > { %v376_v1 = vadd.f32 %v375_v62, %v307_v58  ;;  %v386_v2 = vadd.f32 %v385_v63, %v317_v60  ;;  %v377_v3 = vpop.f32.mrb[9].mxu0  ;;  %v387_v4 = vpop.f32.mrb[1].mxu1  ;;  %v937_v63 = vld [vmem:[%s1244_s1 + $0x30] sm:$0xff]  }
 0x1dd   : > { %v378_v5 = vadd.f32 %v377_v3, %v307_v58  ;;  %v388_v6 = vadd.f32 %v387_v4, %v317_v60  ;;  %v379_v7 = vpop.f32.mrb[10].mxu0  ;;  %v389_v8 = vpop.f32.mrb[2].mxu1 }
 0x1de   : > { %v380_v9 = vadd.f32 %v379_v7, %v312_v59  ;;  %v390_v10 = vadd.f32 %v389_v8, %v322_v61  ;;  %v381_v12 = vpop.f32.mrb[11].mxu0  ;;  %v391_v11 = vpop.f32.mrb[3].mxu1  ;;  %v394_v15 = vmax.f32 %v376_v1, 0.0  ;;  %v398_v16 = vmax.f32 %v386_v2, 0.0  ;;  %v938_v1 = vld [vmem:[%s1244_s1 + $0x38] sm:$0xff]  }
 0x1df   : > { %v382_v13 = vadd.f32 %v381_v12, %v312_v59  ;;  %v392_v14 = vadd.f32 %v391_v11, %v322_v61  ;;  %v395_v19 = vmax.f32 %v378_v5, 0.0  ;;  %v399_v20 = vmax.f32 %v388_v6, 0.0  ;;  %v668_v2 = vpop.permute.xlu0 %667  ;;  %v673_v6 = vpop.permute.xlu1 %672 }
 0x1e0   : > { %v396_v17 = vmax.f32 %v380_v9, 0.0  ;;  %v400_v18 = vmax.f32 %v390_v10, 0.0 }
 0x1e1   : > { %v397_v21 = vmax.f32 %v382_v13, 0.0  ;;  %v401_v22 = vmax.f32 %v392_v14, 0.0 }
 0x1e2   : > { %v402_v23 = vpack.c.bf16 %v396_v17, %v394_v15  ;;  %v404_v24 = vpack.c.bf16 %v400_v18, %v398_v16 }
 0x1e3   : > { %v403_v25 = vpack.c.bf16 %v397_v21, %v395_v19  ;;  %v405_v26 = vpack.c.bf16 %v401_v22, %v399_v20  ;;  %v678_v16 = vpop.permute.xlu0 %677  ;;  %v683_v21 = vpop.permute.xlu1 %682 }
 0x1e5   : > { %450 = vmatprep.subr.bf16.mxu0 %v403_v25 }
 0x1e6   : > { %451 = vmatpush1.bf16.msra.mxu0 %v402_v23 }
 0x1e7   : > { %452 = vmatprep.subr.bf16.mxu0 %v405_v26 }
 0x1ea   : > { %453 = vmatpush1.bf16.msra.mxu0 %v404_v24 }
 0x1ed   : > { %855 = vmatmul.mubr.msk.bf16.vlgmr.msra.gmra.mrb[12].mxu0 %vm334_vm2, %v933_v27 }
 0x1ee   : > { %492 = vmatprep.mubr.bf16.mxu0 %v1003_v0 }
 0x1f5   : > { %856 = vmatmul.mubr.msk.bf16.gmra.mrb[16].mxu0 %vm334_vm2, %v934_v28 }
 0x1f6   : > { %747 = vmatprep.mubr.bf16.mxu0 %v1003_v0 }
 0x2c0   : > { %v484_v32 = vpop.f32.mrb[12].mxu0 }
 0x2c1   : > { %v485_v33 = vadd.f32 %v484_v32, %v417_v31  ;;  %v486_v34 = vpop.f32.mrb[13].mxu0 }
 0x2c2   : > { %v487_v36 = vadd.f32 %v486_v34, %v417_v31  ;;  %v488_v37 = vpop.f32.mrb[14].mxu0  ;;  %v710_v34 = vpop.permute.xlu0 %709 }
 0x2c3   : > { %v489_v38 = vadd.f32 %v488_v37, %v422_v35  ;;  %v490_v39 = vpop.f32.mrb[15].mxu0  ;;  %v503_v41 = vmax.f32 %v485_v33, 0.0  ;;  %v705_v33 = vld [vmem:[%s1244_s1 + $0x50] sm:$0xf] }
 0x2c4   : > { %v491_v40 = vadd.f32 %v490_v39, %v422_v35  ;;  %v504_v43 = vmax.f32 %v487_v36, 0.0 }
 0x2c5   : > { %v505_v42 = vmax.f32 %v489_v38, 0.0 }
 0x2c6   : > { %v506_v44 = vmax.f32 %v491_v40, 0.0 }
 0x2c7   : > { %v511_v45 = vpack.c.bf16 %v505_v42, %v503_v41 }
 0x2c8   : > { %v512_v47 = vpack.c.bf16 %v506_v44, %v504_v43  ;;  %v494_v48 = vpop.f32.mrb[16].mxu0 }
 0x2c9   : > { %v495_v49 = vadd.f32 %v494_v48, %v427_v46  ;;  %v496_v50 = vpop.f32.mrb[17].mxu0 }
 0x2ca   : > { %v497_v52 = vadd.f32 %v496_v50, %v427_v46  ;;  %v498_v53 = vpop.f32.mrb[18].mxu0  ;;  %608 = vmatprep.subr.bf16.mxu1 %v512_v47 }
 0x2cb   : > { %v499_v54 = vadd.f32 %v498_v53, %v432_v51  ;;  %v500_v55 = vpop.f32.mrb[19].mxu0  ;;  %609 = vmatpush1.bf16.msra.mxu1 %v511_v45  ;;  %v507_v57 = vmax.f32 %v495_v49, 0.0 }
 0x2cc   : > { %v501_v56 = vadd.f32 %v500_v55, %v432_v51  ;;  %v508_v59 = vmax.f32 %v497_v52, 0.0 }
 0x2cd   : > { %v509_v58 = vmax.f32 %v499_v54, 0.0 }
 0x2ce   : > { %v510_v60 = vmax.f32 %v501_v56, 0.0 }
 0x2cf   : > { %v513_v61 = vpack.c.bf16 %v509_v58, %v507_v57 }
 0x2d0   : > { %v514_v62 = vpack.c.bf16 %v510_v60, %v508_v59 }
 0x2d2   : > { %610 = vmatprep.subr.bf16.mxu1 %v514_v62 }
 0x2d3   : > { %611 = vmatpush1.bf16.msra.mxu1 %v513_v61 }
 0x2d6   : > { %864 = vmatmul.mubr.msk.bf16.vlgmr.msra.gmra.mrb[4].mxu1 %vm334_vm2, %v937_v63 }
 0x2d7   : > { %650 = vmatprep.mubr.bf16.mxu1 %v1003_v0 }
 0x2de   : > { %865 = vmatmul.mubr.msk.bf16.gmra.mrb[8].mxu1 %vm334_vm2, %v938_v1 }
 0x3a9   : > { %v642_v3 = vpop.f32.mrb[4].mxu1 }
 0x3aa   : > { %v685_v4 = vadd.f32 %v668_v2, %v642_v3  ;;  %v644_v5 = vpop.f32.mrb[5].mxu1 }
 0x3ab   : > { %v686_v7 = vadd.f32 %v668_v2, %v644_v5  ;;  %v646_v8 = vpop.f32.mrb[6].mxu1 }
 0x3ac   : > { %v687_v9 = vadd.f32 %v673_v6, %v646_v8  ;;  %v648_v10 = vpop.f32.mrb[7].mxu1  ;;  %v693_v11 = vmax.f32 %v685_v4, 0.0 }
 0x3ad   : > { %v688_v12 = vadd.f32 %v673_v6, %v648_v10  ;;  %v694_v14 = vmax.f32 %v686_v7, 0.0 }
 0x3ae   : > { %v695_v13 = vmax.f32 %v687_v9, 0.0 }
 0x3af   : > { %v696_v0 = vmax.f32 %v688_v12, 0.0 }
 0x3b0   : > { %v701_v15 = vpack.c.bf16 %v695_v13, %v693_v11 }
 0x3b1   : > { %v702_v17 = vpack.c.bf16 %v696_v0, %v694_v14  ;;  %v652_v18 = vpop.f32.mrb[8].mxu1 }
 0x3b2   : > { %v689_v19 = vadd.f32 %v678_v16, %v652_v18  ;;  %v654_v20 = vpop.f32.mrb[9].mxu1 }
 0x3b3   : > { %v690_v22 = vadd.f32 %v678_v16, %v654_v20  ;;  %v656_v23 = vpop.f32.mrb[10].mxu1  ;;  %715 = vmatprep.subr.bf16.mxu0 %v702_v17 }
 0x3b4   : > { %v691_v24 = vadd.f32 %v683_v21, %v656_v23  ;;  %v658_v25 = vpop.f32.mrb[11].mxu1  ;;  %716 = vmatpush1.bf16.msra.mxu0 %v701_v15  ;;  %v697_v27 = vmax.f32 %v689_v19, 0.0 }
 0x3b5   : > { %v692_v26 = vadd.f32 %v683_v21, %v658_v25  ;;  %v698_v29 = vmax.f32 %v690_v22, 0.0 }
 0x3b6   : > { %v699_v28 = vmax.f32 %v691_v24, 0.0 }
 0x3b7   : > { %v700_v30 = vmax.f32 %v692_v26, 0.0 }
 0x3b8   : > { %v703_v31 = vpack.c.bf16 %v699_v28, %v697_v27 }
 0x3b9   : > { %v704_v32 = vpack.c.bf16 %v700_v30, %v698_v29 }
 0x3bb   : > { %717 = vmatprep.subr.bf16.mxu0 %v704_v32 }
 0x3bc   : > { %718 = vmatpush1.bf16.msra.mxu0 %v703_v31 }
 0x3bf   : > { %866 = vmatmul.mubr.msk.bf16.vlgmr.msra.gmra.mrb[20].mxu0 %vm334_vm2, %v705_v33 }
 0x492   : > { %v749_v35 = vpop.f32.mrb[20].mxu0 }
 0x493   : > { %v750_v36 = vadd.f32 %v749_v35, %v710_v34  ;;  %v751_v37 = vpop.f32.mrb[21].mxu0 }
 0x494   : > { %v752_v38 = vadd.f32 %v751_v37, %v710_v34  ;;  %v753_v39 = vpop.f32.mrb[22].mxu0 }
 0x495   : > { %v754_v40 = vpop.f32.mrb[23].mxu0 }
 0x496   : > { %v758_v41 = vcombine.low %v750_v36, %v752_v38 }
 0x498   : > { %760 = vst [vmem:[%s164_s7] sm:$0x77] %v758_v41 }
 0x499   : > { %952 = shalt.err (!%p949_p3)
}
 0x49a   : > { %s953_s25 = scalar_lea.hbm %s1201_s11, 128  ;;  %s957_s28 = scalar_lea.hbm %s1246_s3, 512 }
 0x49b   : > { %p954_p4 = scmp.ne.s32.totalorder %s1201_s11, %s953_s25  ;;  %p958_p9 = scmp.lt.u32.totalorder %s1201_s11, %s1246_s3 }
 0x49c   : > { %p959_p10 = scmp.lt.u32.totalorder %s957_s28, %s953_s25  ;;  %p961_p12 = scmp.lt.u32.totalorder %s953_s25, %s1201_s11 }
 0x49d   : > { %p955_p7 = pnand %p954_p4, %p1063_p5 }
 0x49e   : > { %p960_p11 = por %p959_p10, %p958_p9 }
 0x49f   : > { %p956_p8 = pneg %p955_p7 }
 0x4a0   : > { %p962_p13 = por %p961_p12, %p960_p11 }
 0x4a2   : > { %p963_p0 = pnand %p962_p13, %p956_p8 }
 0x4a4   : > { %966 = shalt.err (!%p963_p0)
}
 0x4a5   : > { %885 = dma.vmem_to_hbm [thread:$0]  (%p1063_p5), %s1203_s8, 128, %s1201_s11, %s762_s17  }
 0x4a6 PF: > { %p891_p1 = scmp.ge.s32.totalorder %s1001_s15, 2  ;;  %s788_s4 = sand.u32 1, %s989_s12  }
 0x4a7   : > { %s789_s5 = scalar_lea.sflag [#allocation3], %s788_s4 }
 0x4a8   : > { %p888_p2 = pnand %p891_p1, %p1067_p6 }
 0x4aa   : > { %984 = dma.done.wait (!%p888_p2), %s789_s5, 128  }
 0x4ab   : > { %986 = vsyncadd (!%p888_p2), %s789_s5, 4294967168  ;;  %p13_p3 = scmp.ge.s32.totalorder %s1050_s18, 6   ;;  %s1249_s12 = smov %s993_s13 }
 0x4ac   : > { %s1250_s13 = smov %s997_s14  ;;  %s1251_s14 = smov %s1061_s21 }
 0x4ad   : > { %s1252_s15 = smov %s1050_s18  ;;  %15 = sbr.rel (!%p13_p3) target bundleno = 3 (0x3), region = 67 }
 0x4b4   :  { %794 = vsyncpa [#allocation3], 1 }
 0x4b5   :  { %796 = vsyncpa [#allocation3 + $0x1], 1 }

</bundles_post_ra>
